<compile_context>
chip_gen: v7x
topology: tpu7x:2x2x1
jax: 0.10.0
libtpu: 0.0.40
codegen_flags: <defaults>
</compile_context>

<pallas_src>
import jax
import jax.numpy as jnp
from jax import lax
from jax.experimental import pallas as pl
from jax.experimental.pallas import tpu as pltpu


# ----------------------------------------------------------------------------
# Prologue: BatchNorm (training-mode batch stats) + row-L2 normalisation,
# computed ONCE for the whole (B, D) activation and emitted in matmul dtype.
# ----------------------------------------------------------------------------
def bn_l2_prologue_kernel(x_ref, gamma_ref, beta_ref, f_ref):
    x = x_ref[...].astype(jnp.float32)            # (B, D)
    gamma = gamma_ref[...].astype(jnp.float32)    # (1, D)
    beta = beta_ref[...].astype(jnp.float32)      # (1, D)

    inv_b = 1.0 / x.shape[0]

    # BatchNorm1d, training mode (biased batch statistics).  Shifted two-pass
    # variance (sum of centered squares) avoids E[x^2]-E[x]^2 cancellation.
    mean = jnp.sum(x, axis=0, keepdims=True) * inv_b          # (1, D)
    xc = x - mean                                             # (B, D)
    var = jnp.sum(xc * xc, axis=0, keepdims=True) * inv_b     # (1, D)
    scale = gamma * lax.rsqrt(var + 1e-5)                     # (1, D)
    f = scale * xc + beta                                     # (B, D)

    # Row L2 normalisation folded directly into f (done once here: B*D work,
    # instead of B*C work in every classifier tile).  Single EUP rsqrt; the
    # tiny eps on sumsq mimics PyTorch's "+1e-8 on the norm".
    sumsq = jnp.sum(f * f, axis=1, keepdims=True)             # (B, 1)
    inv_norm = lax.rsqrt(sumsq + 1e-16)                       # (B, 1)
    f_ref[...] = (f * inv_norm).astype(f_ref.dtype)


# ----------------------------------------------------------------------------
# Classifier: grid over class tiles, bf16-fed MXU with f32 accumulation.
# ----------------------------------------------------------------------------
def classifier_kernel(f_ref, w_ref, b_ref, out_ref):
    acc = jnp.dot(f_ref[...], w_ref[...],
                  preferred_element_type=jnp.float32)         # (B, TILE_C)
    out_ref[...] = (acc + b_ref[...].astype(jnp.float32)).astype(out_ref.dtype)


def _round_up(n, m):
    return ((n + m - 1) // m) * m


def classblock_forward(x, gamma, beta, w_t, b, *, tile_c=512,
                       matmul_dtype=jnp.bfloat16, out_dtype=jnp.float32,
                       single_buffer_f=None):
    """x: (B, D); gamma/beta: (1, D); w_t: (D, C); b: (1, C) -> (B, C)."""
    B, D = x.shape
    C = w_t.shape[1]

    # --- Prologue (runs once): BN + L2-norm + cast, hoisted out of the grid.
    # Whole-array blocks; batch is never split (BN needs full-batch stats).
    f_q = pl.pallas_call(
        bn_l2_prologue_kernel,
        out_shape=jax.ShapeDtypeStruct((B, D), matmul_dtype),
    )(x, gamma, beta)

    # --- Lane-dense output: pad class dim to a multiple of 128 and tile it.
    tile_c = _round_up(min(tile_c, _round_up(C, 128)), 128)
    c_pad = _round_up(C, tile_c)
    if c_pad != C:
        w_t = jnp.pad(w_t, ((0, 0), (0, c_pad - C)))
        b = jnp.pad(b, ((0, 0), (0, c_pad - C)))

    # bf16 weights: halves the dominant HBM traffic, full-rate MXU on all gens.
    w_q = w_t.astype(matmul_dtype)

    # Constant-index resident f block: single-buffer it when it is big enough
    # for the reclaimed VMEM (B*D bytes) to matter (funds bigger weight tiles,
    # most relevant on v7x's 64 MiB VMEM).  Zero perf cost either way.
    if single_buffer_f is None:
        single_buffer_f = (B * D * jnp.dtype(matmul_dtype).itemsize) >= (2 << 20)
    f_spec_kwargs = dict(pipeline_mode=pl.Buffered(1)) if single_buffer_f else {}

    grid = (c_pad // tile_c,)
    out = pl.pallas_call(
        classifier_kernel,
        out_shape=jax.ShapeDtypeStruct((B, c_pad), out_dtype),
        grid=grid,
        in_specs=[
            pl.BlockSpec((B, D), lambda j: (0, 0), **f_spec_kwargs),  # f (resident)
            pl.BlockSpec((D, tile_c), lambda j: (0, j)),   # weight tile (pipelined)
            pl.BlockSpec((1, tile_c), lambda j: (0, j)),   # bias tile
        ],
        out_specs=pl.BlockSpec((B, tile_c), lambda j: (0, j)),
        compiler_params=pltpu.CompilerParams(
            # Class tiles are independent -> megacore-split on v7x.
            dimension_semantics=("parallel",)),
    )(f_q, w_q, b)
    return out[:, :C]


if __name__ == "__main__":
    key = jax.random.PRNGKey(0)
    k_x, k_g, k_w = jax.random.split(key, 3)

    # Small shapes consistent with the module: x is (batch, input_dim).
    B, input_dim, class_num = 8, 64, 32

    x = jax.random.normal(k_x, (B, input_dim), dtype=jnp.float32)

    # weights_init_kaiming for BatchNorm1d: weight ~ N(1.0, 0.02), bias = 0.
    gamma = (1.0 + 0.02 * jax.random.normal(k_g, (1, input_dim))).astype(jnp.float32)
    beta = jnp.zeros((1, input_dim), dtype=jnp.float32)

    # weights_init_classifier for Linear: weight ~ N(0, 0.001), bias = 0.
    # PyTorch Linear weight is (class_num, input_dim); pass transposed (D, C).
    w = (0.001 * jax.random.normal(k_w, (class_num, input_dim))).astype(jnp.float32)
    w_t = w.T
    b = jnp.zeros((1, class_num), dtype=jnp.float32)

    out = classblock_forward(x, gamma, beta, w_t, b)
    out = jax.block_until_ready(out)

    # Pure-JAX f32 reference of the same math.  The kernel feeds the MXU in
    # bf16, so tolerances are slightly relaxed vs exact f32.
    # TODO(synk): eval-mode BatchNorm (running_mean/running_var) path not
    # implemented; this kernel matches the module's training-mode statistics.
    mean = jnp.mean(x, axis=0, keepdims=True)
    var = jnp.mean((x - mean) ** 2, axis=0, keepdims=True)
    f = gamma * (x - mean) / jnp.sqrt(var + 1e-5) + beta
    f = f / (jnp.linalg.norm(f, axis=1, keepdims=True) + 1e-8)
    ref = f @ w_t + b

    assert out.shape == (B, class_num)
    assert jnp.allclose(out, ref, atol=1e-4, rtol=1e-2), (
        float(jnp.max(jnp.abs(out - ref))))

    print("KERNEL_OK")
</pallas_src>

<mosaic_0001>
module attributes {stable_mosaic.version = 11 : i64} {
  func.func @bn_l2_prologue_kernel(%arg0: memref<8x64xf32, #tpu.memory_space<vmem>>, %arg1: memref<1x64xf32, #tpu.memory_space<vmem>>, %arg2: memref<1x64xf32, #tpu.memory_space<vmem>>, %arg3: memref<8x64xbf16, #tpu.memory_space<vmem>>) attributes {dimension_semantics = [], scalar_prefetch = 0 : i64, scratch_operands = 0 : i64, tpu.core_type = #tpu.core_type<tc>} {
    %c0 = arith.constant 0 : index
    %c0_0 = arith.constant 0 : index
    %0 = vector.load %arg0[%c0, %c0_0] : memref<8x64xf32, #tpu.memory_space<vmem>>, vector<8x64xf32>
    %c0_1 = arith.constant 0 : index
    %c0_2 = arith.constant 0 : index
    %1 = vector.load %arg1[%c0_1, %c0_2] : memref<1x64xf32, #tpu.memory_space<vmem>>, vector<1x64xf32>
    %c0_3 = arith.constant 0 : index
    %c0_4 = arith.constant 0 : index
    %2 = vector.load %arg2[%c0_3, %c0_4] : memref<1x64xf32, #tpu.memory_space<vmem>>, vector<1x64xf32>
    %cst = arith.constant dense<0.000000e+00> : vector<64xf32>
    %3 = vector.multi_reduction <add>, %0, %cst [0] : vector<8x64xf32> to vector<64xf32>
    %4 = vector.shape_cast %3 : vector<64xf32> to vector<1x64xf32>
    %cst_5 = arith.constant 1.250000e-01 : f32
    %5 = vector.broadcast %cst_5 : f32 to vector<1x64xf32>
    %6 = arith.mulf %4, %5 : vector<1x64xf32>
    %7 = vector.broadcast %6 : vector<1x64xf32> to vector<8x64xf32>
    %8 = arith.subf %0, %7 : vector<8x64xf32>
    %9 = arith.mulf %8, %8 : vector<8x64xf32>
    %cst_6 = arith.constant dense<0.000000e+00> : vector<64xf32>
    %10 = vector.multi_reduction <add>, %9, %cst_6 [0] : vector<8x64xf32> to vector<64xf32>
    %11 = vector.shape_cast %10 : vector<64xf32> to vector<1x64xf32>
    %cst_7 = arith.constant 1.250000e-01 : f32
    %12 = vector.broadcast %cst_7 : f32 to vector<1x64xf32>
    %13 = arith.mulf %11, %12 : vector<1x64xf32>
    %cst_8 = arith.constant 9.99999974E-6 : f32
    %14 = vector.broadcast %cst_8 : f32 to vector<1x64xf32>
    %15 = arith.addf %13, %14 : vector<1x64xf32>
    %16 = math.rsqrt %15 : vector<1x64xf32>
    %17 = arith.mulf %1, %16 : vector<1x64xf32>
    %18 = vector.broadcast %17 : vector<1x64xf32> to vector<8x64xf32>
    %19 = arith.mulf %18, %8 : vector<8x64xf32>
    %20 = vector.broadcast %2 : vector<1x64xf32> to vector<8x64xf32>
    %21 = arith.addf %19, %20 : vector<8x64xf32>
    %22 = arith.mulf %21, %21 : vector<8x64xf32>
    %cst_9 = arith.constant dense<0.000000e+00> : vector<8xf32>
    %23 = vector.multi_reduction <add>, %22, %cst_9 [1] : vector<8x64xf32> to vector<8xf32>
    %24 = vector.shape_cast %23 : vector<8xf32> to vector<8x1xf32>
    %cst_10 = arith.constant 1.000000e-16 : f32
    %25 = vector.broadcast %cst_10 : f32 to vector<8x1xf32>
    %26 = arith.addf %24, %25 : vector<8x1xf32>
    %27 = math.rsqrt %26 : vector<8x1xf32>
    %28 = vector.broadcast %27 : vector<8x1xf32> to vector<8x64xf32>
    %29 = arith.mulf %21, %28 : vector<8x64xf32>
    %30 = arith.truncf %29 : vector<8x64xf32> to vector<8x64xbf16>
    %c0_11 = arith.constant 0 : index
    %c0_12 = arith.constant 0 : index
    %31 = vector.load %arg3[%c0_11, %c0_12] : memref<8x64xbf16, #tpu.memory_space<vmem>>, vector<8x64xbf16>
    tpu.vector_store %arg3[%c0_11, %c0_12], %30 {strides = array<i32>} : memref<8x64xbf16, #tpu.memory_space<vmem>>, vector<8x64xbf16>,
    return
  }
}

</mosaic_0001>

<bundles_post_ra>
// kernel: tpu_custom_call.1
= control target key start
LH: loop header
LB: loop body
LE: loop exit
PB: predicated region body
PF: predicated region fallthrough
CT: control target
= control target key end

     0   :  { %8 = vsyncpa [#allocation3], 0  ;;  %s201_s0 = inlined_call_operand.hbm [shape: f32[8,64], index: 0, kind: input, shape index: {}]   ;;  %s202_s1 = inlined_call_operand.vmem [shape: f32[1,64], index: 1, kind: input, shape index: {}]   ;;  %s203_s2 = inlined_call_operand.vmem [shape: f32[1,64], index: 2, kind: input, shape index: {}]   ;;  %s204_s3 = inlined_call_operand.hbm [shape: bf16[8,64], index: 3, kind: output, shape index: {}]  }
   0x1   :  { %9 = vsyncpa [#allocation4], 0  ;;  %s146_s12 = smov [#allocation2]   ;;  %s98_s16 = scalar_lea.hbm %s201_s0, 128 }
   0x2   :  { %s16_s13 = sshll.u32 %s146_s12, 4  ;;  %p99_p0 = scmp.ne.s32.totalorder %s201_s0, %s98_s16  ;;  %s17_s13 = int_to_ptr.vmem [resolvable:$true] %s16_s13 }
   0x3   :  { %p102_p1 = scmp.lt.u32.totalorder %s98_s16, %s201_s0 }
   0x5   :  { %p104_p2 = pnand %p102_p1, %p99_p0 }
   0x7   :  { %107 = shalt.err (!%p104_p2)
}
   0x8   :  { %s108_s21 = scalar_lea.vmem %s17_s13, 128  ;;  %p113_p4 = scmp.lt.s32.totalorder %s17_s13, %s17_s13 }
   0x9   :  { %p109_p3 = scmp.ne.s32.totalorder %s17_s13, %s108_s21  ;;  %p114_p5 = scmp.lt.s32.totalorder %s108_s21, %s108_s21 }
   0xb   :  { %p115_p6 = por %p114_p5, %p113_p4 }
   0xd   :  { %p116_p7 = pnand %p115_p6, %p109_p3 }
   0xf   :  { %119 = shalt.err (!%p116_p7)
}
  0x10   :  { %19 = dma.hbm_to_vmem [thread:$0]  %s201_s0, 128, %s17_s13, [#allocation3]  }
  0x11   :  { %142 = dma.done.wait [#allocation3], 128  }
  0x12   :  { %143 = vsyncadd [#allocation3], 4294967168  ;;  %vm30_vm0 = vcmask 523264   ;;  %v27_v0 = vld [vmem:[#allocation2] sm:$0xff]  ;;  %v53_v20 = vlaneseq  ;;  %s147_s27 = smov [#allocation5]   ;;  %vm74_vm1 = vcmask 519168  }
  0x13   :  { %v31_v1 = vsel %vm30_vm0, %v27_v0, 0.0  ;;  %v28_v22 = vld [vmem:[%s202_s1] sm:$0x1]  ;;  %s82_s1 = sshll.u32 %s147_s27, 4  ;;  %s83_s1 = int_to_ptr.vmem [resolvable:$true] %s82_s1 }
  0x14   :  { %v32_v2 = vrot.slane %v31_v1, 4  ;;  %v54_v21 = vshrl.u32 %v53_v20, 7  ;;  %v91_v27 = vld [vmem:[%s203_s2] ss:$0 sm:$0xff]  ;;  %s120_s28 = scalar_lea.vmem %s83_s1, 64  ;;  %p125_p9 = scmp.lt.s32.totalorder %s83_s1, %s83_s1 }
  0x15   :  { %p121_p8 = scmp.ne.s32.totalorder %s83_s1, %s120_s28  ;;  %p126_p10 = scmp.lt.s32.totalorder %s120_s28, %s120_s28 }
  0x16   :  { %v33_v3 = vadd.f32 %v32_v2, %v31_v1  ;;  %v55_v23 = vsub.s32 0, %v54_v21 }
  0x17   :  { %p127_p11 = por %p126_p10, %p125_p9 }
  0x18   :  { %v34_v4 = vrot.slane %v33_v3, 2 }
  0x19   :  { %p128_p12 = pnand %p127_p11, %p121_p8 }
  0x1a   :  { %v35_v5 = vadd.f32 %v34_v4, %v33_v3 }
  0x1c   :  { %v36_v6 = vrot.slane %v35_v5, 1 }
  0x1e   :  { %v37_v7 = vadd.f32 %v36_v6, %v35_v5 }
  0x20   :  { %v38_v8 = vmul.f32 0.125, %v37_v7 }
  0x22   :  { %v39_v9 = vsub.f32 %v27_v0, %v38_v8 }
  0x24   :  { %v40_v10 = vmul.f32 %v39_v9, %v39_v9 }
  0x26   :  { %v41_v11 = vsel %vm30_vm0, %v40_v10, 0.0 }
  0x27   :  { %v42_v12 = vrot.slane %v41_v11, 4 }
  0x29   :  { %v43_v13 = vadd.f32 %v42_v12, %v41_v11 }
  0x2b   :  { %v44_v14 = vrot.slane %v43_v13, 2 }
  0x2d   :  { %v45_v15 = vadd.f32 %v44_v14, %v43_v13 }
  0x2f   :  { %v46_v16 = vrot.slane %v45_v15, 1 }
  0x31   :  { %v47_v17 = vadd.f32 %v46_v16, %v45_v15 }
  0x33   :  { %v48_v18 = vmul.f32 0.125, %v47_v17 }
  0x35   :  { %v49_v19 = vadd.f32 1e-05, %v48_v18 }
  0x37   :  { %94 = vrsqrt.f32 %v49_v19 }
  0x41   :  { %v95_v24 = vpop.eup %94 }
  0x42   :  { %v51_v25 = vmul.f32 %v95_v24, %v28_v22 }
  0x44   :  { %v56_v26 = vrot.slane %v51_v25, %v55_v23 }
  0x46   :  { %v58_v28 = vmul.f32 %v56_v26, %v39_v9 }
  0x48   :  { %v65_v29 = vadd.f32 %v91_v27, %v58_v28 }
  0x4a   :  { %v66_v30 = vmul.f32 %v65_v29, %v65_v29 }
  0x4c   :  { %v67_v31 = vsel %vm30_vm0, %v66_v30, 0.0 }
  0x4d   :  { %68 = vadd.xlane.f32.xlu0 %v67_v31 }
  0xda   :  { %v69_v32 = vpop.xlane.xlu0 %68 }
  0xdb   :  { %v70_v33 = vadd.f32 1e-16, %v69_v32 }
  0xdd   :  { %96 = vrsqrt.f32 %v70_v33 }
  0xe7   :  { %v97_v34 = vpop.eup %96 }
  0xe8   :  { %v72_v35 = vmul.f32 %v97_v34, %v65_v29 }
  0xea   :  { %v73_v36 = vpack.c.bf16 %v72_v35, %v72_v35 }
  0xec   :  { %75 = vst.msk [vmem:[#allocation5] sm:$0xf] %vm74_vm1, %v73_v36 }
  0xed   :  { %131 = shalt.err (!%p128_p12)
}
  0xee   :  { %s132_s30 = scalar_lea.hbm %s204_s3, 64 }
  0xef   :  { %p133_p13 = scmp.ne.s32.totalorder %s204_s3, %s132_s30  ;;  %p136_p0 = scmp.lt.u32.totalorder %s132_s30, %s204_s3 }
  0xf1   :  { %p138_p1 = pnand %p136_p0, %p133_p13 }
  0xf3   :  { %141 = shalt.err (!%p138_p1)
}
  0xf4   :  { %85 = dma.vmem_to_hbm [thread:$0]  %s83_s1, 64, %s204_s3, [#allocation4]  }
  0xf5   :  { %144 = dma.done.wait [#allocation4], 64  }
  0xf6   :  { %145 = vsyncadd [#allocation4], 4294967232 }
  0xf7   :  { %89 = vsyncpa [#allocation3], 1 }
  0xf8   :  { %90 = vsyncpa [#allocation4], 1 }

</bundles_post_ra>
